<compile_context>
chip_gen: v7x
topology: tpu7x:2x2x1
jax: 0.10.0
libtpu: 0.0.40
codegen_flags: <defaults>
</compile_context>

<pallas_src>
import jax
import jax.numpy as jnp
from jax.experimental import pallas as pl
from jax.experimental.pallas import tpu as pltpu

D_IN, H1, H2, C = 2048, 512, 100, 2
TK = 512                      # fc1 reduction tile (multiple of 128) -> 4 grid steps


def classifier_kernel(x_ref, w1_ref, b1_ref, w2_ref, b2_ref, w3_ref, b3_ref,
                      out_ref, acc_ref):
    k = pl.program_id(0)

    # Zero the fc1 accumulator on the first K step.
    @pl.when(k == 0)
    def _():
        acc_ref[...] = jnp.zeros_like(acc_ref)

    # fc1 partial product for this K chunk: bf16 weights widened in-register,
    # f32 accumulation (HBM traffic stays bf16, which is what matters here).
    acc_ref[...] += jnp.dot(
        x_ref[...], w1_ref[...].astype(jnp.float32),
        preferred_element_type=jnp.float32)

    # Epilogue (fc2 / fc3 / log_softmax / store) only on the last K step.
    @pl.when(k == pl.num_programs(0) - 1)
    def _():
        h1 = jnp.maximum(acc_ref[...] + b1_ref[...], 0.0)          # (B, 512)

        h2 = jnp.dot(h1, w2_ref[...].astype(jnp.float32),
                     preferred_element_type=jnp.float32)
        h2 = jnp.maximum(h2 + b2_ref[...], 0.0)                    # (B, 100)

        logits = jnp.dot(h2, w3_ref[...].astype(jnp.float32),
                         preferred_element_type=jnp.float32)
        logits = logits + b3_ref[...]                              # (B, 2)

        # Numerically stable log_softmax over the class axis
        # (== PyTorch per-sample dim=0 on the 1-D logit vector).
        m = jnp.max(logits, axis=-1, keepdims=True)
        shifted = logits - m
        lse = jnp.log(jnp.sum(jnp.exp(shifted), axis=-1, keepdims=True))
        out_ref[...] = shifted - lse


@jax.jit
def classifier_forward(x, w1, b1, w2, b2, w3, b3):
    B = x.shape[0]
    n_k = D_IN // TK

    flops = 2 * B * (D_IN * H1 + H1 * H2 + H2 * C)
    bytes_accessed = (
        x.size * x.dtype.itemsize
        + w1.size * w1.dtype.itemsize + b1.size * b1.dtype.itemsize
        + w2.size * w2.dtype.itemsize + b2.size * b2.dtype.itemsize
        + w3.size * w3.dtype.itemsize + b3.size * b3.dtype.itemsize
        + B * C * 4)
    cost = pl.CostEstimate(flops=flops,
                           transcendentals=B * (C + 1),
                           bytes_accessed=bytes_accessed)

    return pl.pallas_call(
        classifier_kernel,
        out_shape=jax.ShapeDtypeStruct((B, C), jnp.float32),
        grid_spec=pltpu.PrefetchScalarGridSpec(
            num_scalar_prefetch=0,
            grid=(n_k,),
            in_specs=[
                pl.BlockSpec((B, TK), lambda k: (0, k)),     # x: stream K chunks
                pl.BlockSpec((TK, H1), lambda k: (k, 0)),    # w1 (bf16): stream K chunks
                pl.BlockSpec((1, H1), lambda k: (0, 0)),     # b1 (resident)
                pl.BlockSpec((H1, H2), lambda k: (0, 0)),    # w2 (bf16, resident)
                pl.BlockSpec((1, H2), lambda k: (0, 0)),     # b2
                pl.BlockSpec((H2, C), lambda k: (0, 0)),     # w3 (bf16, resident)
                pl.BlockSpec((1, C), lambda k: (0, 0)),      # b3
            ],
            out_specs=pl.BlockSpec((B, C), lambda k: (0, 0)),
            scratch_shapes=[pltpu.VMEM((B, H1), jnp.float32)],
        ),
        compiler_params=pltpu.CompilerParams(
            dimension_semantics=("arbitrary",)),   # reduction axis
        cost_estimate=cost,
    )(x, w1, b1, w2, b2, w3, b3)


def reference_forward(x, w1, b1, w2, b2, w3, b3):
    # Pure-JAX reference using the same bf16-stored weights (widened to f32).
    h1 = jnp.maximum(x @ w1.astype(jnp.float32) + b1, 0.0)
    h2 = jnp.maximum(h1 @ w2.astype(jnp.float32) + b2, 0.0)
    logits = h2 @ w3.astype(jnp.float32) + b3
    return jax.nn.log_softmax(logits, axis=-1)


if __name__ == "__main__":
    key = jax.random.PRNGKey(0)
    kx, k1, kb1, k2, kb2, k3, kb3 = jax.random.split(key, 7)

    B = 8
    x = jax.random.normal(kx, (B, D_IN), dtype=jnp.float32)

    # Deterministic synthetic parameters (nn.Linear shapes, stored transposed
    # as (in, out)). Weights live in HBM as bfloat16; biases stay f32 (tiny).
    w1 = (jax.random.normal(k1, (D_IN, H1), dtype=jnp.float32)
          * (1.0 / D_IN ** 0.5)).astype(jnp.bfloat16)
    b1 = jax.random.normal(kb1, (1, H1), dtype=jnp.float32) * 0.01
    w2 = (jax.random.normal(k2, (H1, H2), dtype=jnp.float32)
          * (1.0 / H1 ** 0.5)).astype(jnp.bfloat16)
    b2 = jax.random.normal(kb2, (1, H2), dtype=jnp.float32) * 0.01
    w3 = (jax.random.normal(k3, (H2, C), dtype=jnp.float32)
          * (1.0 / H2 ** 0.5)).astype(jnp.bfloat16)
    b3 = jax.random.normal(kb3, (1, C), dtype=jnp.float32) * 0.01

    out = classifier_forward(x, w1, b1, w2, b2, w3, b3)
    out = jax.block_until_ready(out)

    ref = reference_forward(x, w1, b1, w2, b2, w3, b3)
    assert out.shape == (B, C), out.shape
    assert jnp.allclose(out, ref, atol=1e-4, rtol=1e-4), (
        float(jnp.max(jnp.abs(out - ref))))

    print("KERNEL_OK")
</pallas_src>

<mosaic_0001>
module attributes {stable_mosaic.version = 11 : i64} {
  func.func @classifier_kernel(%arg0: i32, %arg1: memref<8x512xf32, #tpu.memory_space<vmem>>, %arg2: memref<512x512xbf16, #tpu.memory_space<vmem>>, %arg3: memref<1x512xf32, #tpu.memory_space<vmem>>, %arg4: memref<512x100xbf16, #tpu.memory_space<vmem>>, %arg5: memref<1x100xf32, #tpu.memory_space<vmem>>, %arg6: memref<100x2xbf16, #tpu.memory_space<vmem>>, %arg7: memref<1x2xf32, #tpu.memory_space<vmem>>, %arg8: memref<8x2xf32, #tpu.memory_space<vmem>>, %arg9: memref<8x512xf32, #tpu.memory_space<vmem>>) attributes {dimension_semantics = [#tpu.dimension_semantics<arbitrary>], iteration_bounds = array<i64: 4>, scalar_prefetch = 0 : i64, scratch_operands = 1 : i64, tpu.core_type = #tpu.core_type<tc>, window_params = [{transform_indices = @transform_0, window_bounds = array<i64: 8, 512>}, {transform_indices = @transform_1, window_bounds = array<i64: 512, 512>}, {pipeline_mode = #tpu.pipeline_mode<synchronous>, transform_indices = @transform_2, window_bounds = array<i64: 1, 512>}, {pipeline_mode = #tpu.pipeline_mode<synchronous>, transform_indices = @transform_3, window_bounds = array<i64: 512, 100>}, {pipeline_mode = #tpu.pipeline_mode<synchronous>, transform_indices = @transform_4, window_bounds = array<i64: 1, 100>}, {pipeline_mode = #tpu.pipeline_mode<synchronous>, transform_indices = @transform_5, window_bounds = array<i64: 100, 2>}, {pipeline_mode = #tpu.pipeline_mode<synchronous>, transform_indices = @transform_6, window_bounds = array<i64: 1, 2>}, {pipeline_mode = #tpu.pipeline_mode<synchronous>, transform_indices = @transform_7, window_bounds = array<i64: 8, 2>}]} {
    %c0_i32 = arith.constant 0 : i32
    %0 = arith.cmpi eq, %arg0, %c0_i32 : i32
    %1 = arith.extui %0 : i1 to i32
    %c0_i32_0 = arith.constant 0 : i32
    %2 = arith.cmpi ne, %1, %c0_i32_0 : i32
    scf.if %2 {
      %cst_9 = arith.constant 0.000000e+00 : f32
      %13 = vector.broadcast %cst_9 : f32 to vector<8x512xf32>
      %c0_10 = arith.constant 0 : index
      %c0_11 = arith.constant 0 : index
      %14 = vector.load %arg9[%c0_10, %c0_11] : memref<8x512xf32, #tpu.memory_space<vmem>>, vector<8x512xf32>
      tpu.vector_store %arg9[%c0_10, %c0_11], %13 {strides = array<i32>} : memref<8x512xf32, #tpu.memory_space<vmem>>, vector<8x512xf32>,
    } else {
    }
    %c0 = arith.constant 0 : index
    %c0_1 = arith.constant 0 : index
    %3 = vector.load %arg9[%c0, %c0_1] : memref<8x512xf32, #tpu.memory_space<vmem>>, vector<8x512xf32>
    %c0_2 = arith.constant 0 : index
    %c0_3 = arith.constant 0 : index
    %4 = vector.load %arg1[%c0_2, %c0_3] : memref<8x512xf32, #tpu.memory_space<vmem>>, vector<8x512xf32>
    %c0_4 = arith.constant 0 : index
    %c0_5 = arith.constant 0 : index
    %5 = vector.load %arg2[%c0_4, %c0_5] : memref<512x512xbf16, #tpu.memory_space<vmem>>, vector<512x512xbf16>
    %6 = arith.extf %5 : vector<512x512xbf16> to vector<512x512xf32>
    %cst = arith.constant dense<0.000000e+00> : vector<8x512xf32>
    %7 = tpu.matmul %4, %6, %cst {dimension_numbers = #tpu.dot_dimension_numbers<[1], [0], [0], [1], [0, 0, 1, 1], [], []>} : vector<8x512xf32>, vector<512x512xf32>, vector<8x512xf32> -> vector<8x512xf32>
    %8 = arith.addf %3, %7 : vector<8x512xf32>
    %c0_6 = arith.constant 0 : index
    %c0_7 = arith.constant 0 : index
    %9 = vector.load %arg9[%c0_6, %c0_7] : memref<8x512xf32, #tpu.memory_space<vmem>>, vector<8x512xf32>
    tpu.vector_store %arg9[%c0_6, %c0_7], %8 {strides = array<i32>} : memref<8x512xf32, #tpu.memory_space<vmem>>, vector<8x512xf32>,
    %c3_i32 = arith.constant 3 : i32
    %10 = arith.cmpi eq, %arg0, %c3_i32 : i32
    %11 = arith.extui %10 : i1 to i32
    %c0_i32_8 = arith.constant 0 : i32
    %12 = arith.cmpi ne, %11, %c0_i32_8 : i32
    scf.if %12 {
      %c0_9 = arith.constant 0 : index
      %c0_10 = arith.constant 0 : index
      %13 = vector.load %arg9[%c0_9, %c0_10] : memref<8x512xf32, #tpu.memory_space<vmem>>, vector<8x512xf32>
      %c0_11 = arith.constant 0 : index
      %c0_12 = arith.constant 0 : index
      %14 = vector.load %arg3[%c0_11, %c0_12] : memref<1x512xf32, #tpu.memory_space<vmem>>, vector<1x512xf32>
      %15 = vector.broadcast %14 : vector<1x512xf32> to vector<8x512xf32>
      %16 = arith.addf %13, %15 : vector<8x512xf32>
      %cst_13 = arith.constant 0.000000e+00 : f32
      %17 = vector.broadcast %cst_13 : f32 to vector<8x512xf32>
      %18 = arith.maximumf %16, %17 : vector<8x512xf32>
      %c0_14 = arith.constant 0 : index
      %c0_15 = arith.constant 0 : index
      %19 = vector.load %arg4[%c0_14, %c0_15] : memref<512x100xbf16, #tpu.memory_space<vmem>>, vector<512x100xbf16>
      %20 = arith.extf %19 : vector<512x100xbf16> to vector<512x100xf32>
      %cst_16 = arith.constant dense<0.000000e+00> : vector<8x100xf32>
      %21 = tpu.matmul %18, %20, %cst_16 {dimension_numbers = #tpu.dot_dimension_numbers<[1], [0], [0], [1], [0, 0, 1, 1], [], []>} : vector<8x512xf32>, vector<512x100xf32>, vector<8x100xf32> -> vector<8x100xf32>
      %c0_17 = arith.constant 0 : index
      %c0_18 = arith.constant 0 : index
      %22 = vector.load %arg5[%c0_17, %c0_18] : memref<1x100xf32, #tpu.memory_space<vmem>>, vector<1x100xf32>
      %23 = vector.broadcast %22 : vector<1x100xf32> to vector<8x100xf32>
      %24 = arith.addf %21, %23 : vector<8x100xf32>
      %cst_19 = arith.constant 0.000000e+00 : f32
      %25 = vector.broadcast %cst_19 : f32 to vector<8x100xf32>
      %26 = arith.maximumf %24, %25 : vector<8x100xf32>
      %c0_20 = arith.constant 0 : index
      %c0_21 = arith.constant 0 : index
      %27 = vector.load %arg6[%c0_20, %c0_21] : memref<100x2xbf16, #tpu.memory_space<vmem>>, vector<100x2xbf16>
      %28 = arith.extf %27 : vector<100x2xbf16> to vector<100x2xf32>
      %cst_22 = arith.constant dense<0.000000e+00> : vector<8x2xf32>
      %29 = tpu.matmul %26, %28, %cst_22 {dimension_numbers = #tpu.dot_dimension_numbers<[1], [0], [0], [1], [0, 0, 1, 1], [], []>} : vector<8x100xf32>, vector<100x2xf32>, vector<8x2xf32> -> vector<8x2xf32>
      %c0_23 = arith.constant 0 : index
      %c0_24 = arith.constant 0 : index
      %30 = vector.load %arg7[%c0_23, %c0_24] : memref<1x2xf32, #tpu.memory_space<vmem>>, vector<1x2xf32>
      %31 = vector.broadcast %30 : vector<1x2xf32> to vector<8x2xf32>
      %32 = arith.addf %29, %31 : vector<8x2xf32>
      %cst_25 = arith.constant dense<0xFF800000> : vector<8xf32>
      %33 = vector.multi_reduction <maximumf>, %32, %cst_25 [1] : vector<8x2xf32> to vector<8xf32>
      %34 = vector.shape_cast %33 : vector<8xf32> to vector<8x1xf32>
      %35 = vector.broadcast %34 : vector<8x1xf32> to vector<8x2xf32>
      %36 = arith.subf %32, %35 : vector<8x2xf32>
      %37 = math.exp %36 : vector<8x2xf32>
      %cst_26 = arith.constant dense<0.000000e+00> : vector<8xf32>
      %38 = vector.multi_reduction <add>, %37, %cst_26 [1] : vector<8x2xf32> to vector<8xf32>
      %39 = vector.shape_cast %38 : vector<8xf32> to vector<8x1xf32>
      %40 = math.log %39 : vector<8x1xf32>
      %41 = vector.broadcast %40 : vector<8x1xf32> to vector<8x2xf32>
      %42 = arith.subf %36, %41 : vector<8x2xf32>
      %c0_27 = arith.constant 0 : index
      %c0_28 = arith.constant 0 : index
      %43 = vector.load %arg8[%c0_27, %c0_28] : memref<8x2xf32, #tpu.memory_space<vmem>>, vector<8x2xf32>
      tpu.vector_store %arg8[%c0_27, %c0_28], %42 {strides = array<i32>} : memref<8x2xf32, #tpu.memory_space<vmem>>, vector<8x2xf32>,
    } else {
    }
    return
  }
  func.func @transform_0(%arg0: i32) -> (i32, i32) {
    %c0_i32 = arith.constant 0 : i32
    %c0_i32_0 = arith.constant 0 : i32
    return %c0_i32, %arg0 : i32, i32
  }
  func.func @transform_1(%arg0: i32) -> (i32, i32) {
    %c0_i32 = arith.constant 0 : i32
    %c0_i32_0 = arith.constant 0 : i32
    return %arg0, %c0_i32 : i32, i32
  }
  func.func @transform_2(%arg0: i32) -> (i32, i32) {
    %c0_i32 = arith.constant 0 : i32
    %c0_i32_0 = arith.constant 0 : i32
    %c0_i32_1 = arith.constant 0 : i32
    return %c0_i32, %c0_i32_0 : i32, i32
  }
  func.func @transform_3(%arg0: i32) -> (i32, i32) {
    %c0_i32 = arith.constant 0 : i32
    %c0_i32_0 = arith.constant 0 : i32
    %c0_i32_1 = arith.constant 0 : i32
    return %c0_i32, %c0_i32_0 : i32, i32
  }
  func.func @transform_4(%arg0: i32) -> (i32, i32) {
    %c0_i32 = arith.constant 0 : i32
    %c0_i32_0 = arith.constant 0 : i32
    %c0_i32_1 = arith.constant 0 : i32
    return %c0_i32, %c0_i32_0 : i32, i32
  }
  func.func @transform_5(%arg0: i32) -> (i32, i32) {
    %c0_i32 = arith.constant 0 : i32
    %c0_i32_0 = arith.constant 0 : i32
    %c0_i32_1 = arith.constant 0 : i32
    return %c0_i32, %c0_i32_0 : i32, i32
  }
  func.func @transform_6(%arg0: i32) -> (i32, i32) {
    %c0_i32 = arith.constant 0 : i32
    %c0_i32_0 = arith.constant 0 : i32
    %c0_i32_1 = arith.constant 0 : i32
    return %c0_i32, %c0_i32_0 : i32, i32
  }
  func.func @transform_7(%arg0: i32) -> (i32, i32) {
    %c0_i32 = arith.constant 0 : i32
    %c0_i32_0 = arith.constant 0 : i32
    %c0_i32_1 = arith.constant 0 : i32
    return %c0_i32, %c0_i32_0 : i32, i32
  }
}

</mosaic_0001>

<bundles_post_ra>
// kernel: classifier_forward.1
= control target key start
LH: loop header
LB: loop body
LE: loop exit
PB: predicated region body
PF: predicated region fallthrough
CT: control target
= control target key end

     0   :  { %12 = vsyncpa [#allocation4], 0  ;;  %s3414_s0 = inlined_call_operand.hbm [shape: f32[8,2048], index: 0, kind: input, shape index: {}]   ;;  %s3415_s1 = inlined_call_operand.hbm [shape: bf16[2048,512], index: 1, kind: input, shape index: {}]   ;;  %s3416_s2 = inlined_call_operand.hbm [shape: f32[1,512], index: 2, kind: input, shape index: {}]   ;;  %s3417_s3 = inlined_call_operand.vmem [shape: bf16[512,100], index: 3, kind: input, shape index: {}]   ;;  %s3418_s4 = inlined_call_operand.hbm [shape: f32[1,100], index: 4, kind: input, shape index: {}]   ;;  %s3419_s5 = inlined_call_operand.vmem [shape: bf16[100,2], index: 5, kind: input, shape index: {}]   ;;  %s3420_s6 = inlined_call_operand.hbm [shape: f32[1,2], index: 6, kind: input, shape index: {}]   ;;  %s3421_s7 = inlined_call_operand.vmem [shape: f32[8,2], index: 7, kind: output, shape index: {}]  }
   0x1   :  { %14 = vsyncpa [#allocation4 + $0x1], 0 }
   0x2   :  { %15 = vsyncpa [#allocation6], 0 }
   0x3   :  { %17 = vsyncpa [#allocation6 + $0x1], 0 }
   0x4   :  { %18 = vsyncpa [#allocation9], 0  ;;  %s2904_s24 = smov 0   ;;  %s2906_s25 = smov 0  }
   0x5   :  { %s2908_s26 = smov 0   ;;  %s2910_s27 = smov 0  }
   0x6 LB: > { %s2923_s28 = sadd.s32 4294967295, %s2851_s27   ;;  %p44_p0 = scmp.ne.s32.totalorder %s2843_s25, %s2839_s24  ;;  %s2851_s27 = sphi %s2910_s27, %s3440_s27   ;;  %s2847_s26 = sphi %s2908_s26, %s3439_s26   ;;  %s2843_s25 = sphi %s2906_s25, %s3438_s25   ;;  %s2839_s24 = sphi %s2904_s24, %s3437_s24  }
   0x7   : > { %p3422_p1 = scmp.eq.s32.totalorder %s2923_s28, 0  ;;  %p1584_p2 = scmp.ge.s32.totalorder %s2851_s27, 1 }
   0x8   : > { %p207_p3 = scmp.lt.s32.totalorder %s2851_s27, 5  ;;  %s2853_s8 = smov [#allocation7]  }
   0x9   : > { %p2932_p5 = por %p3422_p1, %p44_p0  ;;  %s220_s9 = sshll.u32 %s2853_s8, 4  ;;  %s221_s9 = int_to_ptr.vmem [resolvable:$true] %s220_s9 }
   0xa   : > { %p2936_p6 = pnand %p1584_p2, %p207_p3  ;;  %s2854_s10 = smov [#allocation8]  }
   0xb   : > { %s3425_s29 = scalar_select %p2932_p5, 1, 0 }
   0xc   : > { %s3426_s30 = scalar_select %p2936_p6, 1, 0 }
   0xd   : > { %p2400_p7 = pneg %p2936_p6  ;;  %s234_s11 = sshll.u32 %s2854_s10, 4  ;;  %s2948_s11 = int_to_ptr.vmem [resolvable:$true] %s234_s11 }
   0xe   : > { %s2855_s13 = smov [#allocation10]   ;;  %s2661_s17 = scalar_lea.hbm %s3416_s2, 64 }
   0xf   : > { %p2944_p8 = pnand %p2400_p7, %p3422_p1  ;;  %s248_s14 = sshll.u32 %s2855_s13, 4  ;;  %s2950_s14 = int_to_ptr.vmem [resolvable:$true] %s248_s14 }
  0x10   : > { %p2662_p9 = scmp.ne.s32.totalorder %s3416_s2, %s2661_s17  ;;  %p2668_p13 = scmp.lt.u32.totalorder %s2661_s17, %s3416_s2 }
  0x11   : > { %p2960_p10 = pneg %p2944_p8 }
  0x13   : > { %p2664_p11 = pnand %p2960_p10, %p2662_p9 }
  0x15   : > { %p2665_p12 = pneg %p2664_p11 }
  0x17   : > { %p2670_p0 = pnand %p2668_p13, %p2665_p12 }
  0x19   : > { %2673 = shalt.err (!%p2670_p0)
}
  0x1a   : > { %s2674_s23 = scalar_lea.vmem %s221_s9, 64  ;;  %p2682_p4 = scmp.lt.s32.totalorder %s221_s9, %s221_s9 }
  0x1b   : > { %p2675_p2 = scmp.ne.s32.totalorder %s221_s9, %s2674_s23  ;;  %p2683_p1 = scmp.lt.s32.totalorder %s2674_s23, %s2674_s23 }
  0x1d   : > { %p2677_p3 = pnand %p2675_p2, %p2960_p10  ;;  %p2684_p5 = por %p2683_p1, %p2682_p4 }
  0x1f   : > { %p2678_p7 = pneg %p2677_p3 }
  0x21   : > { %p2685_p6 = pnand %p2684_p5, %p2678_p7 }
  0x23   : > { %2688 = shalt.err (!%p2685_p6)
}
  0x24   : > { %2403 = dma.hbm_to_vmem [thread:$0]  (!%p2944_p8), %s3416_s2, 64, %s221_s9, [#allocation6]  }
  0x25   : > { %s2689_s15 = scalar_lea.hbm %s3418_s4, 16 }
  0x26   : > { %p2690_p9 = scmp.ne.s32.totalorder %s3418_s4, %s2689_s15  ;;  %p2696_p4 = scmp.lt.u32.totalorder %s2689_s15, %s3418_s4 }
  0x28   : > { %p2692_p11 = pnand %p2690_p9, %p2960_p10 }
  0x2a   : > { %p2693_p1 = pneg %p2692_p11 }
  0x2c   : > { %p2698_p5 = pnand %p2696_p4, %p2693_p1 }
  0x2e   : > { %2701 = shalt.err (!%p2698_p5)
}
  0x2f   : > { %s2702_s9 = scalar_lea.vmem %s2948_s11, 16  ;;  %s2709_s21 = scalar_lea.vmem %s2948_s11, 32 }
  0x30   : > { %p2703_p6 = scmp.ne.s32.totalorder %s2948_s11, %s2702_s9  ;;  %p2710_p0 = scmp.lt.s32.totalorder %s2948_s11, %s2948_s11 }
  0x31   : > { %p2711_p2 = scmp.lt.s32.totalorder %s2709_s21, %s2702_s9 }
  0x32   : > { %p2705_p12 = pnand %p2703_p6, %p2960_p10 }
  0x33   : > { %p2712_p3 = por %p2711_p2, %p2710_p0 }
  0x34   : > { %p2706_p13 = pneg %p2705_p12 }
  0x36   : > { %p2713_p7 = pnand %p2712_p3, %p2706_p13 }
  0x38   : > { %2716 = shalt.err (!%p2713_p7)
}
  0x39   : > { %2406 = dma.hbm_to_vmem [thread:$0]  (!%p2944_p8), %s3418_s4, 16, %s2948_s11, [#allocation9]  }
  0x3a   : > { %s2717_s10 = scalar_lea.hbm %s3420_s6, 16 }
  0x3b   : > { %p2718_p9 = scmp.ne.s32.totalorder %s3420_s6, %s2717_s10  ;;  %p2724_p4 = scmp.lt.u32.totalorder %s2717_s10, %s3420_s6 }
  0x3d   : > { %p2720_p11 = pnand %p2718_p9, %p2960_p10 }
  0x3f   : > { %p2721_p1 = pneg %p2720_p11 }
  0x41   : > { %p2726_p5 = pnand %p2724_p4, %p2721_p1 }
  0x43   : > { %2729 = shalt.err (!%p2726_p5)
}
  0x44   : > { %s2730_s11 = scalar_lea.vmem %s2950_s14, 16  ;;  %s2737_s18 = scalar_lea.vmem %s2950_s14, 32 }
  0x45   : > { %p2731_p6 = scmp.ne.s32.totalorder %s2950_s14, %s2730_s11  ;;  %p2738_p0 = scmp.lt.s32.totalorder %s2950_s14, %s2950_s14 }
  0x46   : > { %p2739_p2 = scmp.lt.s32.totalorder %s2737_s18, %s2730_s11 }
  0x47   : > { %p2733_p12 = pnand %p2731_p6, %p2960_p10 }
  0x48   : > { %p2740_p3 = por %p2739_p2, %p2738_p0 }
  0x49   : > { %p2734_p13 = pneg %p2733_p12 }
  0x4b   : > { %p2741_p7 = pnand %p2740_p3, %p2734_p13 }
  0x4d   : > { %2744 = shalt.err (!%p2741_p7)
}
  0x4e   : > { %2409 = dma.hbm_to_vmem [thread:$0]  (!%p2944_p8), %s3420_s6, 16, %s2950_s14, [#allocation9]  }
  0x4f   : > { %s3025_s20 = sadd.s32 1, %s2851_s27   ;;  %s31_s12 = sadd.s32 1, %s2847_s26 }
  0x50   : > { %s28_s21 = ssub.s32 %s2851_s27, %s3025_s20  ;;  %p38_p9 = scmp.ne.s32.totalorder %s2847_s26, %s2843_s25 }
  0x51   : > { %p29_p10 = scmp.eq.s32.totalorder %s28_s21, 0  ;;  %p39_p11 = scmp.eq.s32.totalorder %s2851_s27, 0 }
  0x52   : > { %p2420_p1 = scmp.lt.s32.totalorder %s2851_s27, 4  ;;  %s3038_s23 = sand.u32 1, %s2847_s26  }
  0x53   : > { %s3035_s22 = scalar_select %p29_p10, %s2847_s26, %s31_s12  }
  0x54   : > { %p40_p4 = por %p39_p11, %p38_p9  ;;  %s1589_s24 = sshll.u32 %s3038_s23, 5 }
  0x55   : > { %s1610_s14 = sshll.u32 %s2851_s27, 9  ;;  %s263_s15 = scalar_lea.vmem [#allocation3], %s1589_s24 }
  0x56   : > { %s3045_s13 = scalar_lea.hbm %s3414_s0, %s1610_s14  ;;  %s271_s16 = sshll.u32 %s263_s15, 4  ;;  %s3047_s16 = int_to_ptr.vmem [resolvable:$true] %s271_s16 }
  0x57   : > { %p3049_p8 = pnand %p2420_p1, %p40_p4  ;;  %s1592_s11 = sshll.u32 %s3038_s23, 10 }
  0x58   : > { %s278_s18 = sand.u32 1, %s2851_s27   ;;  %s260_s19 = scalar_lea.sflag [#allocation4], %s3038_s23 }
  0x59   : > { %s2745_s9 = scalar_lea.hbm %s3045_s13, 512  ;;  %p2747_p6 = pneg %p3049_p8 }
  0x5a   : > { %p2746_p5 = scmp.ne.s32.totalorder %s3045_s13, %s2745_s9  ;;  %s2750_s24 = scalar_lea.hbm %s3414_s0, 2048 }
  0x5b   : > { %p2751_p0 = scmp.lt.u32.totalorder %s3045_s13, %s3414_s0  ;;  %p2752_p2 = scmp.lt.u32.totalorder %s2750_s24, %s2745_s9 }
  0x5c   : > { %p2748_p12 = pnand %p2747_p6, %p2746_p5  ;;  %p2754_p7 = scmp.lt.u32.totalorder %s2745_s9, %s3045_s13 }
  0x5d   : > { %p2753_p3 = por %p2752_p2, %p2751_p0 }
  0x5e   : > { %p2749_p13 = pneg %p2748_p12 }
  0x5f   : > { %p2755_p10 = por %p2754_p7, %p2753_p3 }
  0x61   : > { %p2756_p9 = pnand %p2755_p10, %p2749_p13 }
  0x63   : > { %2759 = shalt.err (!%p2756_p9)
}
  0x64   : > { %s2760_s10 = scalar_lea.vmem %s3047_s16, 512  ;;  %s2856_s15 = smov [#allocation3]  }
  0x65   : > { %p2761_p11 = scmp.ne.s32.totalorder %s3047_s16, %s2760_s10  ;;  %s2765_s21 = sshll.u32 %s2856_s15, 4  ;;  %s2766_s21 = int_to_ptr.vmem [resolvable:$false] %s2765_s21 }
  0x66   : > { %s2767_s12 = scalar_lea.vmem %s2766_s21, 1024  ;;  %p2768_p5 = scmp.lt.s32.totalorder %s3047_s16, %s2766_s21 }
  0x67   : > { %p2763_p1 = pnand %p2761_p11, %p2747_p6  ;;  %p2769_p12 = scmp.lt.s32.totalorder %s2767_s12, %s2760_s10 }
  0x69   : > { %p2764_p4 = pneg %p2763_p1  ;;  %p2770_p0 = por %p2769_p12, %p2768_p5 }
  0x6b   : > { %p2771_p2 = pnand %p2770_p0, %p2764_p4 }
  0x6d   : > { %2774 = shalt.err (!%p2771_p2)
}
  0x6e   : > { %2413 = dma.hbm_to_vmem [thread:$0]  (!%p3049_p8), %s3045_s13, 512, %s3047_s16, %s260_s19  }
  0x6f   : > { %s282_s9 = scalar_lea.vmem [#allocation5], %s1592_s11  ;;  %s1612_s14 = sshll.u32 %s2851_s27, 14 }
  0x70   : > { %s290_s24 = sshll.u32 %s282_s9, 4  ;;  %s3089_s15 = scalar_lea.hbm %s3415_s1, %s1612_s14  ;;  %s3083_s24 = int_to_ptr.vmem [resolvable:$true] %s290_s24 }
  0x71   : > { %s3093_s21 = scalar_lea.sflag [#allocation6], %s278_s18  ;;  %s2775_s12 = scalar_lea.hbm %s3089_s15, 16384 }
  0x72   : > { %p2776_p13 = scmp.ne.s32.totalorder %s3089_s15, %s2775_s12  ;;  %s2780_s16 = scalar_lea.hbm %s3415_s1, 65536 }
  0x73   : > { %p2781_p10 = scmp.lt.u32.totalorder %s3089_s15, %s3415_s1  ;;  %p2782_p9 = scmp.lt.u32.totalorder %s2780_s16, %s2775_s12 }
  0x74   : > { %p2778_p3 = pnand %p2776_p13, %p2747_p6  ;;  %p2784_p1 = scmp.lt.u32.totalorder %s2775_s12, %s3089_s15 }
  0x75   : > { %p2783_p11 = por %p2782_p9, %p2781_p10 }
  0x76   : > { %p2779_p7 = pneg %p2778_p3 }
  0x77   : > { %p2785_p4 = por %p2784_p1, %p2783_p11 }
  0x79   : > { %p2786_p5 = pnand %p2785_p4, %p2779_p7 }
  0x7b   : > { %2789 = shalt.err (!%p2786_p5)
}
  0x7c   : > { %s2790_s27 = scalar_lea.vmem %s3083_s24, 16384  ;;  %s2857_s18 = smov [#allocation5]  }
  0x7d   : > { %p2791_p12 = scmp.ne.s32.totalorder %s3083_s24, %s2790_s27  ;;  %s2795_s9 = sshll.u32 %s2857_s18, 4  ;;  %s2796_s9 = int_to_ptr.vmem [resolvable:$false] %s2795_s9 }
  0x7e   : > { %s2797_s14 = scalar_lea.vmem %s2796_s9, 32768  ;;  %p2798_p13 = scmp.lt.s32.totalorder %s3083_s24, %s2796_s9 }
  0x7f   : > { %p2793_p0 = pnand %p2791_p12, %p2747_p6  ;;  %p2799_p3 = scmp.lt.s32.totalorder %s2797_s14, %s2790_s27 }
  0x81   : > { %p2794_p2 = pneg %p2793_p0  ;;  %p2800_p10 = por %p2799_p3, %p2798_p13 }
  0x83   : > { %p2801_p9 = pnand %p2800_p10, %p2794_p2 }
  0x85   : > { %2804 = shalt.err (!%p2801_p9)
}
  0x86   : > { %s2858_s8 = smov 256   ;;  %s2859_s10 = smov 16  }
  0x87   : > { %2416 = dma.hbm_to_vmem [thread:$0]  (!%p3049_p8), %s3089_s15, 16384, %s3083_s24, %s3093_s21, %s2858_s8, %s2858_s8, %s2859_s10  }
  0x88   : > { %p3430_p6 = scmp.ne.s32.totalorder %s3426_s30, 0 }
  0x89   : > { %s304_s12 = sand.u32 (!%p3430_p6), 1, %s2843_s25   ;;  %p3431_p7 = scmp.ne.s32.totalorder (!%p3430_p6), %s3425_s29, 0 }
  0x8a   : > { %302 = sbr.rel (%p3430_p6) target bundleno = 1273 (0x4f9), region = 48  ;;  %s1597_s23 = sshll.u32 (!%p3430_p6), %s304_s12, 5 }
  0x8b   : > { %s305_s13 = scalar_lea.sflag (!%p3430_p6), [#allocation4], %s304_s12  ;;  %s3122_s16 = scalar_lea.vmem (!%p3430_p6), [#allocation3], %s1597_s23 }
  0x91   : > { %2822 = dma.done.wait (%p3431_p7), %s305_s13, 512  }
  0x92   : > { %2824 = vsyncadd (%p3431_p7), %s305_s13, 4294966784  ;;  %s313_s11 = sand.u32 1, %s2923_s28   ;;  %s1598_s17 = sshll.u32 %s304_s12, 10 }
  0x93   : > { %s314_s24 = scalar_lea.sflag [#allocation6], %s313_s11  ;;  %s3129_s15 = scalar_lea.vmem [#allocation5], %s1598_s17 }
  0x94   : > { %2826 = dma.done.wait (%p3431_p7), %s314_s24, 16384  }
  0x95   : > { %2828 = vsyncadd (%p3431_p7), %s314_s24, 4294950912  ;;  %p3432_p8 = scmp.eq.s32.totalorder %s2923_s28, 0 }
  0x97   : > { %2830 = dma.done.wait (%p3432_p8), [#allocation6], 64   ;;  %p3433_p11 = pmov %p3432_p8 }
  0x98   : > { %p3434_p1 = pmov %p3432_p8 }
  0x99   : > { %2832 = vsyncadd (%p3433_p11), [#allocation6], 4294967232 }
  0x9a   : > { %2834 = dma.done.wait (%p3434_p1), [#allocation9], 32   ;;  %p3435_p4 = pmov %p3434_p1 }
  0x9b   : > { %p3436_p5 = scmp.ne.s32.totalorder %s2923_s28, 0 }
  0x9c   : > { %2836 = vsyncadd (%p3435_p4), [#allocation9], 4294967264  ;;  %v2860_v0 = vmov (!%p3436_p5), 0.0  }
  0x9d   : > { %365 = sbr.rel (%p3436_p5) target bundleno = 164 (0xa4), region = 72  ;;  %366 = vst [vmem:[#allocation2] sm:$0xff] (!%p3436_p5), %v2860_v0  ;;  %367 = vst [vmem:[#allocation2 + $0x8] sm:$0xff] (!%p3436_p5), %v2860_v0 }
  0x9e   : > { %368 = vst [vmem:[#allocation2 + $0x10] sm:$0xff] (!%p3436_p5), %v2860_v0  ;;  %369 = vst [vmem:[#allocation2 + $0x18] sm:$0xff] (!%p3436_p5), %v2860_v0 }
  0xa4 PF: > { %v2465_v1 = vld [vmem:[%s3129_s15 + $0x4] ss:$16 sps:$4 sm:$0xff]   ;;  %v2467_v2 = vld [vmem:[%s3129_s15 + $0xc] ss:$16 sps:$4 sm:$0xff]   ;;  %v2469_v3 = vld [vmem:[%s3129_s15] ss:$16 sps:$4 sm:$0xff]  }
  0xa5   : > { %1915 = vmatprep.subr.bf16.mxu0 %v2465_v1  ;;  %v2470_v4 = vld [vmem:[%s3129_s15 + $0x8] ss:$16 sps:$4 sm:$0xff]   ;;  %2043 = vmatprep.subr.bf16.mxu1 %v2467_v2  ;;  %v2471_v5 = vld [vmem:[%s3129_s15 + $0x24] ss:$16 sps:$4 sm:$0xff]   ;;  %v2473_v6 = vld [vmem:[%s3129_s15 + $0x2c] ss:$16 sps:$4 sm:$0xff]  }
  0xa6   : > { %1917 = vmatpush1.bf16.msra.mxu0 %v2469_v3  ;;  %2045 = vmatpush1.bf16.msra.mxu1 %v2470_v4  ;;  %v2475_v7 = vld [vmem:[%s3129_s15 + $0x20] ss:$16 sps:$4 sm:$0xff]   ;;  %v2476_v8 = vld [vmem:[%s3129_s15 + $0x28] ss:$16 sps:$4 sm:$0xff]   ;;  %v2477_v9 = vld [vmem:[%s3129_s15 + $0x44] ss:$16 sps:$4 sm:$0xff]  }
  0xa7   : > { %1919 = vmatprep.subr.bf16.mxu0 %v2471_v5  ;;  %2047 = vmatprep.subr.bf16.mxu1 %v2473_v6  ;;  %v2479_v10 = vld [vmem:[%s3129_s15 + $0x4c] ss:$16 sps:$4 sm:$0xff]   ;;  %v2481_v11 = vld [vmem:[%s3129_s15 + $0x40] ss:$16 sps:$4 sm:$0xff]   ;;  %v2482_v12 = vld [vmem:[%s3129_s15 + $0x48] ss:$16 sps:$4 sm:$0xff]  }
  0xa8   : > { %v2483_v13 = vld [vmem:[%s3129_s15 + $0x64] ss:$16 sps:$4 sm:$0xff]   ;;  %v2485_v14 = vld [vmem:[%s3129_s15 + $0x6c] ss:$16 sps:$4 sm:$0xff]   ;;  %v2487_v15 = vld [vmem:[%s3129_s15 + $0x60] ss:$16 sps:$4 sm:$0xff]  }
  0xa9   : > { %v2488_v16 = vld [vmem:[%s3129_s15 + $0x68] ss:$16 sps:$4 sm:$0xff]   ;;  %v2489_v17 = vld [vmem:[%s3129_s15 + $0x84] ss:$16 sps:$4 sm:$0xff]   ;;  %v2491_v18 = vld [vmem:[%s3129_s15 + $0x8c] ss:$16 sps:$4 sm:$0xff]  }
  0xaa   : > { %1921 = vmatpush1.bf16.msra.mxu0 %v2475_v7  ;;  %2049 = vmatpush1.bf16.msra.mxu1 %v2476_v8  ;;  %v2493_v19 = vld [vmem:[%s3129_s15 + $0x80] ss:$16 sps:$4 sm:$0xff]   ;;  %v2494_v20 = vld [vmem:[%s3129_s15 + $0x88] ss:$16 sps:$4 sm:$0xff]   ;;  %v2495_v21 = vld [vmem:[%s3129_s15 + $0xa4] ss:$16 sps:$4 sm:$0xff]  }
  0xab   : > { %1923 = vmatprep.subr.bf16.mxu0 %v2477_v9  ;;  %2051 = vmatprep.subr.bf16.mxu1 %v2479_v10  ;;  %v2497_v22 = vld [vmem:[%s3129_s15 + $0xac] ss:$16 sps:$4 sm:$0xff]   ;;  %v2499_v23 = vld [vmem:[%s3129_s15 + $0xa0] ss:$16 sps:$4 sm:$0xff]   ;;  %v2500_v24 = vld [vmem:[%s3129_s15 + $0xa8] ss:$16 sps:$4 sm:$0xff]  }
  0xac   : > { %v2501_v25 = vld [vmem:[%s3129_s15 + $0xc4] ss:$16 sps:$4 sm:$0xff]   ;;  %v2503_v26 = vld [vmem:[%s3129_s15 + $0xcc] ss:$16 sps:$4 sm:$0xff]   ;;  %v2505_v27 = vld [vmem:[%s3129_s15 + $0xc0] ss:$16 sps:$4 sm:$0xff]  }
  0xad   : > { %v2506_v28 = vld [vmem:[%s3129_s15 + $0xc8] ss:$16 sps:$4 sm:$0xff]   ;;  %v2507_v29 = vld [vmem:[%s3129_s15 + $0xe4] ss:$16 sps:$4 sm:$0xff]   ;;  %v2509_v30 = vld [vmem:[%s3129_s15 + $0xec] ss:$16 sps:$4 sm:$0xff]  }
  0xae   : > { %1925 = vmatpush1.bf16.msra.mxu0 %v2481_v11  ;;  %2053 = vmatpush1.bf16.msra.mxu1 %v2482_v12  ;;  %v2511_v31 = vld [vmem:[%s3129_s15 + $0xe0] ss:$16 sps:$4 sm:$0xff]   ;;  %v2512_v32 = vld [vmem:[%s3129_s15 + $0xe8] ss:$16 sps:$4 sm:$0xff]   ;;  %v2513_v33 = vld [vmem:[%s3129_s15 + $0x104] ss:$16 sps:$4 sm:$0xff]  }
  0xaf   : > { %1927 = vmatprep.subr.bf16.mxu0 %v2483_v13  ;;  %2055 = vmatprep.subr.bf16.mxu1 %v2485_v14  ;;  %v2515_v34 = vld [vmem:[%s3129_s15 + $0x10c] ss:$16 sps:$4 sm:$0xff]   ;;  %v2517_v35 = vld [vmem:[%s3129_s15 + $0x100] ss:$16 sps:$4 sm:$0xff]   ;;  %v2518_v36 = vld [vmem:[%s3129_s15 + $0x108] ss:$16 sps:$4 sm:$0xff]  }
  0xb0   : > { %v2519_v37 = vld [vmem:[%s3129_s15 + $0x124] ss:$16 sps:$4 sm:$0xff]   ;;  %v2521_v38 = vld [vmem:[%s3129_s15 + $0x12c] ss:$16 sps:$4 sm:$0xff]   ;;  %v2523_v39 = vld [vmem:[%s3129_s15 + $0x120] ss:$16 sps:$4 sm:$0xff]  }
  0xb1   : > { %v2524_v40 = vld [vmem:[%s3129_s15 + $0x128] ss:$16 sps:$4 sm:$0xff]   ;;  %v2525_v41 = vld [vmem:[%s3129_s15 + $0x144] ss:$16 sps:$4 sm:$0xff]   ;;  %v2527_v42 = vld [vmem:[%s3129_s15 + $0x14c] ss:$16 sps:$4 sm:$0xff]  }
  0xb2   : > { %1929 = vmatpush1.bf16.msra.mxu0 %v2487_v15  ;;  %2057 = vmatpush1.bf16.msra.mxu1 %v2488_v16  ;;  %v2529_v43 = vld [vmem:[%s3129_s15 + $0x140] ss:$16 sps:$4 sm:$0xff]   ;;  %v2530_v44 = vld [vmem:[%s3129_s15 + $0x148] ss:$16 sps:$4 sm:$0xff]   ;;  %v2531_v45 = vld [vmem:[%s3129_s15 + $0x164] ss:$16 sps:$4 sm:$0xff]  }
  0xb3   : > { %1931 = vmatprep.subr.bf16.mxu0 %v2489_v17  ;;  %2059 = vmatprep.subr.bf16.mxu1 %v2491_v18  ;;  %v2533_v46 = vld [vmem:[%s3129_s15 + $0x16c] ss:$16 sps:$4 sm:$0xff]   ;;  %v2535_v48 = vld [vmem:[%s3129_s15 + $0x160] ss:$16 sps:$4 sm:$0xff]   ;;  %v2536_v49 = vld [vmem:[%s3129_s15 + $0x168] ss:$16 sps:$4 sm:$0xff]  }
  0xb4   : > { %v375_v47 = vld [vmem:[%s3122_s16 + $0x8] sm:$0xff]  ;;  %v2537_v50 = vld [vmem:[%s3129_s15 + $0x184] ss:$16 sps:$4 sm:$0xff]   ;;  %v2541_v52 = vld [vmem:[%s3129_s15 + $0x180] ss:$16 sps:$4 sm:$0xff]   ;;  %p1603_p12 = scmp.ne.s32.totalorder %s2923_s28, 3 }
  0xb5   : > { %826 = vmatprep.mubr.f32.mxu0 %v375_v47  ;;  %968 = vmatprep.mubr.f32.mxu1 %v375_v47  ;;  %v2539_v51 = vld [vmem:[%s3129_s15 + $0x18c] ss:$16 sps:$4 sm:$0xff]   ;;  %v2542_v53 = vld [vmem:[%s3129_s15 + $0x188] ss:$16 sps:$4 sm:$0xff]   ;;  %v2543_v54 = vld [vmem:[%s3129_s15 + $0x1a4] ss:$16 sps:$4 sm:$0xff]  }
  0xb6   : > { %1933 = vmatpush1.bf16.msra.mxu0 %v2493_v19  ;;  %2061 = vmatpush1.bf16.msra.mxu1 %v2494_v20  ;;  %v2545_v55 = vld [vmem:[%s3129_s15 + $0x1ac] ss:$16 sps:$4 sm:$0xff]   ;;  %v2547_v56 = vld [vmem:[%s3129_s15 + $0x1a0] ss:$16 sps:$4 sm:$0xff]   ;;  %v2548_v57 = vld [vmem:[%s3129_s15 + $0x1a8] ss:$16 sps:$4 sm:$0xff]  }
  0xb7   : > { %1935 = vmatprep.subr.bf16.mxu0 %v2495_v21  ;;  %2063 = vmatprep.subr.bf16.mxu1 %v2497_v22  ;;  %v2549_v58 = vld [vmem:[%s3129_s15 + $0x1c4] ss:$16 sps:$4 sm:$0xff]   ;;  %v2551_v59 = vld [vmem:[%s3129_s15 + $0x1cc] ss:$16 sps:$4 sm:$0xff]   ;;  %v2553_v60 = vld [vmem:[%s3129_s15 + $0x1c0] ss:$16 sps:$4 sm:$0xff]  }
  0xb8   : > { %v2554_v61 = vld [vmem:[%s3129_s15 + $0x1c8] ss:$16 sps:$4 sm:$0xff]   ;;  %v2555_v62 = vld [vmem:[%s3129_s15 + $0x1e4] ss:$16 sps:$4 sm:$0xff]   ;;  %v2557_v63 = vld [vmem:[%s3129_s15 + $0x1ec] ss:$16 sps:$4 sm:$0xff]  }
  0xb9   : > { %v2559_v0 = vld [vmem:[%s3129_s15 + $0x1e0] ss:$16 sps:$4 sm:$0xff]   ;;  %v2560_v1 = vld [vmem:[%s3129_s15 + $0x1e8] ss:$16 sps:$4 sm:$0xff]   ;;  %v2561_v2 = vld [vmem:[%s3129_s15 + $0x204] ss:$16 sps:$4 sm:$0xff]  }
  0xba   : > { %1937 = vmatpush1.bf16.msra.mxu0 %v2499_v23  ;;  %2065 = vmatpush1.bf16.msra.mxu1 %v2500_v24  ;;  %v2564_v3 = vld [vmem:[%s3129_s15 + $0x20c] ss:$16 sps:$4 sm:$0xff]   ;;  %v2563_v4 = vld [vmem:[%s3129_s15 + $0x200] ss:$16 sps:$4 sm:$0xff]   ;;  %v2566_v5 = vld [vmem:[%s3129_s15 + $0x208] ss:$16 sps:$4 sm:$0xff]  }
  0xbb   : > { %1939 = vmatprep.subr.bf16.mxu0 %v2501_v25  ;;  %2067 = vmatprep.subr.bf16.mxu1 %v2503_v26  ;;  %v374_v6 = vld [vmem:[%s3122_s16] sm:$0xff]  ;;  %v2570_v8 = vld [vmem:[%s3129_s15 + $0x22c] ss:$16 sps:$4 sm:$0xff]   ;;  %v2572_v10 = vld [vmem:[%s3129_s15 + $0x228] ss:$16 sps:$4 sm:$0xff]   ;;  %vm1405_vm0 = vcmask (!%p1603_p12), 1043456  }
  0xbc   : > { %v2567_v7 = vld [vmem:[%s3129_s15 + $0x224] ss:$16 sps:$4 sm:$0xff]   ;;  %v2569_v9 = vld [vmem:[%s3129_s15 + $0x220] ss:$16 sps:$4 sm:$0xff]   ;;  %v2576_v12 = vld [vmem:[%s3129_s15 + $0x24c] ss:$16 sps:$4 sm:$0xff]  }
  0xbd   : > { %v2573_v11 = vld [vmem:[%s3129_s15 + $0x244] ss:$16 sps:$4 sm:$0xff]   ;;  %v2575_v13 = vld [vmem:[%s3129_s15 + $0x240] ss:$16 sps:$4 sm:$0xff]   ;;  %v2578_v14 = vld [vmem:[%s3129_s15 + $0x248] ss:$16 sps:$4 sm:$0xff]  }
  0xbe   : > { %1941 = vmatpush1.bf16.msra.mxu0 %v2505_v27  ;;  %2069 = vmatpush1.bf16.msra.mxu1 %v2506_v28  ;;  %v2579_v15 = vld [vmem:[%s3129_s15 + $0x264] ss:$16 sps:$4 sm:$0xff]   ;;  %v2582_v16 = vld [vmem:[%s3129_s15 + $0x26c] ss:$16 sps:$4 sm:$0xff]   ;;  %v2581_v17 = vld [vmem:[%s3129_s15 + $0x260] ss:$16 sps:$4 sm:$0xff]  }
  0xbf   : > { %1943 = vmatprep.subr.bf16.mxu0 %v2507_v29  ;;  %2071 = vmatprep.subr.bf16.mxu1 %v2509_v30  ;;  %v2584_v18 = vld [vmem:[%s3129_s15 + $0x268] ss:$16 sps:$4 sm:$0xff]   ;;  %v2585_v19 = vld [vmem:[%s3129_s15 + $0x284] ss:$16 sps:$4 sm:$0xff]   ;;  %v2588_v20 = vld [vmem:[%s3129_s15 + $0x28c] ss:$16 sps:$4 sm:$0xff]  }
  0xc0   : > { %v2587_v21 = vld [vmem:[%s3129_s15 + $0x280] ss:$16 sps:$4 sm:$0xff]   ;;  %v2590_v22 = vld [vmem:[%s3129_s15 + $0x288] ss:$16 sps:$4 sm:$0xff]   ;;  %v2591_v23 = vld [vmem:[%s3129_s15 + $0x2a4] ss:$16 sps:$4 sm:$0xff]  }
  0xc1   : > { %v2594_v24 = vld [vmem:[%s3129_s15 + $0x2ac] ss:$16 sps:$4 sm:$0xff]   ;;  %v2593_v25 = vld [vmem:[%s3129_s15 + $0x2a0] ss:$16 sps:$4 sm:$0xff]   ;;  %v2596_v26 = vld [vmem:[%s3129_s15 + $0x2a8] ss:$16 sps:$4 sm:$0xff]  }
  0xc2   : > { %1945 = vmatpush1.bf16.msra.mxu0 %v2511_v31  ;;  %2073 = vmatpush1.bf16.msra.mxu1 %v2512_v32  ;;  %v2597_v27 = vld [vmem:[%s3129_s15 + $0x2c4] ss:$16 sps:$4 sm:$0xff]   ;;  %v2600_v28 = vld [vmem:[%s3129_s15 + $0x2cc] ss:$16 sps:$4 sm:$0xff]   ;;  %v2599_v30 = vld [vmem:[%s3129_s15 + $0x2c0] ss:$16 sps:$4 sm:$0xff]  }
  0xc3   : > { %1947 = vmatprep.subr.bf16.mxu0 %v2513_v33  ;;  %2075 = vmatprep.subr.bf16.mxu1 %v2515_v34  ;;  %v377_v29 = vld [vmem:[%s3122_s16 + $0x18] sm:$0xff]  ;;  %v2603_v32 = vld [vmem:[%s3129_s15 + $0x2e4] ss:$16 sps:$4 sm:$0xff]   ;;  %v2605_v34 = vld [vmem:[%s3129_s15 + $0x2e0] ss:$16 sps:$4 sm:$0xff]   ;;  %vm2863_vm1 = vmmov (!%p1603_p12), 0  }
  0xc4   : > { %v2602_v31 = vld [vmem:[%s3129_s15 + $0x2c8] ss:$16 sps:$4 sm:$0xff]   ;;  %v2606_v33 = vld [vmem:[%s3129_s15 + $0x2ec] ss:$16 sps:$4 sm:$0xff]   ;;  %vm1401_vm2 = vcmask (!%p1603_p12), 818176   ;;  %vm1479_vm3 = vcmask (!%p1603_p12), 15360  }
  0xc5   : > { %v2626_v47 = vld [vmem:[%s3129_s15 + $0x348] ss:$16 sps:$4 sm:$0xff]  }
  0xc6   : > { %1949 = vmatpush1.bf16.msra.mxu0 %v2517_v35  ;;  %2077 = vmatpush1.bf16.msra.mxu1 %v2518_v36  ;;  %v2608_v35 = vld [vmem:[%s3129_s15 + $0x2e8] ss:$16 sps:$4 sm:$0xff]   ;;  %v2609_v36 = vld [vmem:[%s3129_s15 + $0x304] ss:$16 sps:$4 sm:$0xff]  }
  0xc7   : > { %1951 = vmatprep.subr.bf16.mxu0 %v2519_v37  ;;  %2079 = vmatprep.subr.bf16.mxu1 %v2521_v38  ;;  %v2612_v37 = vld [vmem:[%s3129_s15 + $0x30c] ss:$16 sps:$4 sm:$0xff]   ;;  %v2611_v38 = vld [vmem:[%s3129_s15 + $0x300] ss:$16 sps:$4 sm:$0xff]  }
  0xca   : > { %1953 = vmatpush1.bf16.msra.mxu0 %v2523_v39  ;;  %2081 = vmatpush1.bf16.msra.mxu1 %v2524_v40  ;;  %v2614_v39 = vld [vmem:[%s3129_s15 + $0x308] ss:$16 sps:$4 sm:$0xff]   ;;  %v2615_v40 = vld [vmem:[%s3129_s15 + $0x324] ss:$16 sps:$4 sm:$0xff]  }
  0xcb   : > { %1955 = vmatprep.subr.bf16.mxu0 %v2525_v41  ;;  %2083 = vmatprep.subr.bf16.mxu1 %v2527_v42  ;;  %v2618_v41 = vld [vmem:[%s3129_s15 + $0x32c] ss:$16 sps:$4 sm:$0xff]   ;;  %v2617_v42 = vld [vmem:[%s3129_s15 + $0x320] ss:$16 sps:$4 sm:$0xff]  }
  0xce   : > { %1957 = vmatpush1.bf16.msra.mxu0 %v2529_v43  ;;  %2085 = vmatpush1.bf16.msra.mxu1 %v2530_v44  ;;  %v2620_v43 = vld [vmem:[%s3129_s15 + $0x328] ss:$16 sps:$4 sm:$0xff]   ;;  %v2621_v44 = vld [vmem:[%s3129_s15 + $0x344] ss:$16 sps:$4 sm:$0xff]  }
  0xcf   : > { %1959 = vmatprep.subr.bf16.mxu0 %v2531_v45  ;;  %2087 = vmatprep.subr.bf16.mxu1 %v2533_v46  ;;  %v2624_v45 = vld [vmem:[%s3129_s15 + $0x34c] ss:$16 sps:$4 sm:$0xff]   ;;  %v2623_v46 = vld [vmem:[%s3129_s15 + $0x340] ss:$16 sps:$4 sm:$0xff]  }
  0xd2   : > { %1961 = vmatpush1.bf16.msra.mxu0 %v2535_v48  ;;  %2089 = vmatpush1.bf16.msra.mxu1 %v2536_v49  ;;  %v2627_v48 = vld [vmem:[%s3129_s15 + $0x364] ss:$16 sps:$4 sm:$0xff]   ;;  %v2630_v49 = vld [vmem:[%s3129_s15 + $0x36c] ss:$16 sps:$4 sm:$0xff]  }
  0xd3   : > { %1963 = vmatprep.subr.bf16.mxu0 %v2537_v50  ;;  %2091 = vmatprep.subr.bf16.mxu1 %v2539_v51  ;;  %v2629_v50 = vld [vmem:[%s3129_s15 + $0x360] ss:$16 sps:$4 sm:$0xff]   ;;  %v2632_v51 = vld [vmem:[%s3129_s15 + $0x368] ss:$16 sps:$4 sm:$0xff]  }
  0xd6   : > { %1965 = vmatpush1.bf16.msra.mxu0 %v2541_v52  ;;  %2093 = vmatpush1.bf16.msra.mxu1 %v2542_v53  ;;  %v2633_v52 = vld [vmem:[%s3129_s15 + $0x384] ss:$16 sps:$4 sm:$0xff]   ;;  %v2636_v53 = vld [vmem:[%s3129_s15 + $0x38c] ss:$16 sps:$4 sm:$0xff]  }
  0xd7   : > { %1967 = vmatprep.subr.bf16.mxu0 %v2543_v54  ;;  %2095 = vmatprep.subr.bf16.mxu1 %v2545_v55  ;;  %v2635_v54 = vld [vmem:[%s3129_s15 + $0x380] ss:$16 sps:$4 sm:$0xff]   ;;  %v2638_v55 = vld [vmem:[%s3129_s15 + $0x388] ss:$16 sps:$4 sm:$0xff]  }
  0xda   : > { %1969 = vmatpush1.bf16.msra.mxu0 %v2547_v56  ;;  %2097 = vmatpush1.bf16.msra.mxu1 %v2548_v57  ;;  %v2639_v56 = vld [vmem:[%s3129_s15 + $0x3a4] ss:$16 sps:$4 sm:$0xff]   ;;  %v2642_v57 = vld [vmem:[%s3129_s15 + $0x3ac] ss:$16 sps:$4 sm:$0xff]  }
  0xdb   : > { %1971 = vmatprep.subr.bf16.mxu0 %v2549_v58  ;;  %2099 = vmatprep.subr.bf16.mxu1 %v2551_v59  ;;  %v2641_v58 = vld [vmem:[%s3129_s15 + $0x3a0] ss:$16 sps:$4 sm:$0xff]   ;;  %v2644_v59 = vld [vmem:[%s3129_s15 + $0x3a8] ss:$16 sps:$4 sm:$0xff]  }
  0xde   : > { %1973 = vmatpush1.bf16.msra.mxu0 %v2553_v60  ;;  %2101 = vmatpush1.bf16.msra.mxu1 %v2554_v61  ;;  %v2645_v60 = vld [vmem:[%s3129_s15 + $0x3c4] ss:$16 sps:$4 sm:$0xff]   ;;  %v2648_v61 = vld [vmem:[%s3129_s15 + $0x3cc] ss:$16 sps:$4 sm:$0xff]  }
  0xdf   : > { %1975 = vmatprep.subr.bf16.mxu0 %v2555_v62  ;;  %2103 = vmatprep.subr.bf16.mxu1 %v2557_v63  ;;  %v2647_v62 = vld [vmem:[%s3129_s15 + $0x3c0] ss:$16 sps:$4 sm:$0xff]   ;;  %v2650_v63 = vld [vmem:[%s3129_s15 + $0x3c8] ss:$16 sps:$4 sm:$0xff]  }
  0xe2   : > { %1977 = vmatpush1.bf16.msra.mxu0 %v2559_v0  ;;  %2105 = vmatpush1.bf16.msra.mxu1 %v2560_v1  ;;  %v2651_v0 = vld [vmem:[%s3129_s15 + $0x3e4] ss:$16 sps:$4 sm:$0xff]   ;;  %v2654_v1 = vld [vmem:[%s3129_s15 + $0x3ec] ss:$16 sps:$4 sm:$0xff]  }
  0xe3   : > { %1979 = vmatprep.subr.bf16.mxu0 %v2561_v2  ;;  %2107 = vmatprep.subr.bf16.mxu1 %v2564_v3  ;;  %v2653_v2 = vld [vmem:[%s3129_s15 + $0x3e0] ss:$16 sps:$4 sm:$0xff]   ;;  %v2656_v3 = vld [vmem:[%s3129_s15 + $0x3e8] ss:$16 sps:$4 sm:$0xff]  }
  0xe5   : > { %827 = vmatmul.mubr.f32.vlgmr.msra.gmra.mrb[0].mxu0 %v374_v6  ;;  %969 = vmatmul.mubr.f32.vlgmr.msra.gmra.mrb[0].mxu1 %v374_v6  ;;  %v372_v6 = vld [vmem:[#allocation2 + $0x10] sm:$0xff] }
  0xe6   : > { %1981 = vmatpush1.bf16.msra.mxu0 %v2563_v4  ;;  %2109 = vmatpush1.bf16.msra.mxu1 %v2566_v5  ;;  %v376_v4 = vld [vmem:[%s3122_s16 + $0x10] sm:$0xff]  ;;  %v370_v5 = vld [vmem:[#allocation2] sm:$0xff] }
  0xe7   : > { %1983 = vmatprep.subr.bf16.mxu0 %v2567_v7  ;;  %2111 = vmatprep.subr.bf16.mxu1 %v2570_v8  ;;  %v371_v7 = vld [vmem:[#allocation2 + $0x8] sm:$0xff]  ;;  %v373_v8 = vld [vmem:[#allocation2 + $0x18] sm:$0xff] }
  0xe8   : > { %897 = vmatprep.mubr.f32.mxu0 %v377_v29  ;;  %1039 = vmatprep.mubr.f32.mxu1 %v377_v29  ;;  %v1766_v29 = vld [vmem:[%s3417_s3 + $0x10] sm:$0xff] (!%p1603_p12)  }
  0xea   : > { %1985 = vmatpush1.bf16.msra.mxu0 %v2569_v9  ;;  %2113 = vmatpush1.bf16.msra.mxu1 %v2572_v10 }
  0xeb   : > { %1987 = vmatprep.subr.bf16.mxu0 %v2573_v11  ;;  %2115 = vmatprep.subr.bf16.mxu1 %v2576_v12 }
  0xee   : > { %1989 = vmatpush1.bf16.msra.mxu0 %v2575_v13  ;;  %2117 = vmatpush1.bf16.msra.mxu1 %v2578_v14 }
  0xef   : > { %1991 = vmatprep.subr.bf16.mxu0 %v2579_v15  ;;  %2119 = vmatprep.subr.bf16.mxu1 %v2582_v16 }
  0xf2   : > { %1993 = vmatpush1.bf16.msra.mxu0 %v2581_v17  ;;  %2121 = vmatpush1.bf16.msra.mxu1 %v2584_v18  ;;  %v1772_v17 = vld [vmem:[%s3417_s3 + $0x40] sm:$0xff] (!%p1603_p12)  }
  0xf3   : > { %1995 = vmatprep.subr.bf16.mxu0 %v2585_v19  ;;  %2123 = vmatprep.subr.bf16.mxu1 %v2588_v20  ;;  %v1614_v18 = vld [vmem:[%s3417_s3] sm:$0xff] (!%p1603_p12)   ;;  %v1064_v20 = vlaneseq (!%p1603_p12) }
  0xf4   : > { %v1788_v19 = vld [vmem:[%s3417_s3 + $0xc0] sm:$0xff] (!%p1603_p12)  }
  0xf6   : > { %1997 = vmatpush1.bf16.msra.mxu0 %v2587_v21  ;;  %2125 = vmatpush1.bf16.msra.mxu1 %v2590_v22  ;;  %v1780_v21 = vld [vmem:[%s3417_s3 + $0x80] sm:$0xff] (!%p1603_p12)   ;;  %v1773_v22 = vld [vmem:[%s3417_s3 + $0x48] sm:$0xff] (!%p1603_p12)  }
  0xf7   : > { %1999 = vmatprep.subr.bf16.mxu0 %v2591_v23  ;;  %2127 = vmatprep.subr.bf16.mxu1 %v2594_v24  ;;  %v1789_v23 = vld [vmem:[%s3417_s3 + $0xc8] sm:$0xff] (!%p1603_p12)  }
  0xf8   : > { %v1765_v24 = vld [vmem:[%s3417_s3 + $0x8] sm:$0xff] (!%p1603_p12)  }
  0xfa   : > { %2001 = vmatpush1.bf16.msra.mxu0 %v2593_v25  ;;  %2129 = vmatpush1.bf16.msra.mxu1 %v2596_v26  ;;  %v1781_v25 = vld [vmem:[%s3417_s3 + $0x88] sm:$0xff] (!%p1603_p12)   ;;  %v1774_v26 = vld [vmem:[%s3417_s3 + $0x50] sm:$0xff] (!%p1603_p12)  }
  0xfb   : > { %2003 = vmatprep.subr.bf16.mxu0 %v2597_v27  ;;  %2131 = vmatprep.subr.bf16.mxu1 %v2600_v28  ;;  %v1790_v27 = vld [vmem:[%s3417_s3 + $0xd0] sm:$0xff] (!%p1603_p12)   ;;  %v1065_v28 = vshrl.u32 (!%p1603_p12), %v1064_v20, 7  ;;  %v1604_v20 = vld [vmem:[#allocation8] ss:$0 sm:$0xff] (!%p1603_p12) }
  0xfe   : > { %2005 = vmatpush1.bf16.msra.mxu0 %v2599_v30  ;;  %2133 = vmatpush1.bf16.msra.mxu1 %v2602_v31  ;;  %v1782_v30 = vld [vmem:[%s3417_s3 + $0x90] sm:$0xff] (!%p1603_p12)   ;;  %v1775_v31 = vld [vmem:[%s3417_s3 + $0x58] sm:$0xff] (!%p1603_p12)  }
  0xff   : > { %2007 = vmatprep.subr.bf16.mxu0 %v2603_v32  ;;  %2135 = vmatprep.subr.bf16.mxu1 %v2606_v33  ;;  %v1791_v32 = vld [vmem:[%s3417_s3 + $0xd8] sm:$0xff] (!%p1603_p12)   ;;  %v1070_v33 = vsub.s32 (!%p1603_p12), 1, %v1065_v28 }
 0x102   : > { %2009 = vmatpush1.bf16.msra.mxu0 %v2605_v34  ;;  %2137 = vmatpush1.bf16.msra.mxu1 %v2608_v35  ;;  %v1078_v34 = vsub.s32 (!%p1603_p12), 3, %v1065_v28  ;;  %v1767_v35 = vld [vmem:[%s3417_s3 + $0x18] sm:$0xff] (!%p1603_p12)  }
 0x103   : > { %2011 = vmatprep.subr.bf16.mxu0 %v2609_v36  ;;  %2139 = vmatprep.subr.bf16.mxu1 %v2612_v37  ;;  %v1783_v36 = vld [vmem:[%s3417_s3 + $0x98] sm:$0xff] (!%p1603_p12)  }
 0x106   : > { %2013 = vmatpush1.bf16.msra.mxu0 %v2611_v38  ;;  %2141 = vmatpush1.bf16.msra.mxu1 %v2614_v39  ;;  %v1062_v38 = vld [vmem:[#allocation7] sm:$0xf] (!%p1603_p12) }
 0x107   : > { %2015 = vmatprep.subr.bf16.mxu0 %v2615_v40  ;;  %2143 = vmatprep.subr.bf16.mxu1 %v2618_v41  ;;  %v1776_v40 = vld [vmem:[%s3417_s3 + $0x60] sm:$0xff] (!%p1603_p12)  }
 0x108   : > { %v1792_v41 = vld [vmem:[%s3417_s3 + $0xe0] sm:$0xff] (!%p1603_p12)  }
 0x10a   : > { %2017 = vmatpush1.bf16.msra.mxu0 %v2617_v42  ;;  %2145 = vmatpush1.bf16.msra.mxu1 %v2620_v43  ;;  %v1071_v42 = vrot.slane (!%p1603_p12), %v1062_v38, %v1070_v33  ;;  %v1079_v43 = vrot.slane (!%p1603_p12), %v1062_v38, %v1078_v34 }
 0x10b   : > { %2019 = vmatprep.subr.bf16.mxu0 %v2621_v44  ;;  %2147 = vmatprep.subr.bf16.mxu1 %v2624_v45 }
 0x10e   : > { %2021 = vmatpush1.bf16.msra.mxu0 %v2623_v46  ;;  %2149 = vmatpush1.bf16.msra.mxu1 %v2626_v47  ;;  %v1768_v46 = vld [vmem:[%s3417_s3 + $0x20] sm:$0xff] (!%p1603_p12)  }
 0x10f   : > { %2023 = vmatprep.subr.bf16.mxu0 %v2627_v48  ;;  %2151 = vmatprep.subr.bf16.mxu1 %v2630_v49  ;;  %v1784_v47 = vld [vmem:[%s3417_s3 + $0xa0] sm:$0xff] (!%p1603_p12)   ;;  %v1777_v48 = vld [vmem:[%s3417_s3 + $0x68] sm:$0xff] (!%p1603_p12)  }
 0x110   : > { %v1793_v49 = vld [vmem:[%s3417_s3 + $0xe8] sm:$0xff] (!%p1603_p12)  }
 0x112   : > { %2025 = vmatpush1.bf16.msra.mxu0 %v2629_v50  ;;  %2153 = vmatpush1.bf16.msra.mxu1 %v2632_v51 }
 0x113   : > { %2027 = vmatprep.subr.bf16.mxu0 %v2633_v52  ;;  %2155 = vmatprep.subr.bf16.mxu1 %v2636_v53  ;;  %v1066_v52 = vsub.s32 (!%p1603_p12), 0, %v1065_v28  ;;  %v1074_v53 = vsub.s32 (!%p1603_p12), 2, %v1065_v28  ;;  %v1605_v28 = vld [vmem:[#allocation10] ss:$0 sm:$0xff] (!%p1603_p12) }
 0x116   : > { %2029 = vmatpush1.bf16.msra.mxu0 %v2635_v54  ;;  %2157 = vmatpush1.bf16.msra.mxu1 %v2638_v55  ;;  %v1769_v54 = vld [vmem:[%s3417_s3 + $0x28] sm:$0xff] (!%p1603_p12)  }
 0x117   : > { %2031 = vmatprep.subr.bf16.mxu0 %v2639_v56  ;;  %2159 = vmatprep.subr.bf16.mxu1 %v2642_v57  ;;  %v1785_v55 = vld [vmem:[%s3417_s3 + $0xa8] sm:$0xff] (!%p1603_p12)   ;;  %v1778_v56 = vld [vmem:[%s3417_s3 + $0x70] sm:$0xff] (!%p1603_p12)  }
 0x118   : > { %v1794_v57 = vld [vmem:[%s3417_s3 + $0xf0] sm:$0xff] (!%p1603_p12)  }
 0x11a   : > { %2033 = vmatpush1.bf16.msra.mxu0 %v2641_v58  ;;  %2161 = vmatpush1.bf16.msra.mxu1 %v2644_v59  ;;  %v1067_v58 = vrot.slane (!%p1603_p12), %v1062_v38, %v1066_v52  ;;  %v1075_v59 = vrot.slane (!%p1603_p12), %v1062_v38, %v1074_v53 }
 0x11b   : > { %2035 = vmatprep.subr.bf16.mxu0 %v2645_v60  ;;  %2163 = vmatprep.subr.bf16.mxu1 %v2648_v61 }
 0x11e   : > { %2037 = vmatpush1.bf16.msra.mxu0 %v2647_v62  ;;  %2165 = vmatpush1.bf16.msra.mxu1 %v2650_v63  ;;  %v1770_v62 = vld [vmem:[%s3417_s3 + $0x30] sm:$0xff] (!%p1603_p12)  }
 0x11f   : > { %2039 = vmatprep.subr.bf16.mxu0 %v2651_v0  ;;  %2167 = vmatprep.subr.bf16.mxu1 %v2654_v1  ;;  %v1786_v63 = vld [vmem:[%s3417_s3 + $0xb0] sm:$0xff] (!%p1603_p12)   ;;  %v1779_v0 = vld [vmem:[%s3417_s3 + $0x78] sm:$0xff] (!%p1603_p12)  }
 0x120   : > { %v1795_v1 = vld [vmem:[%s3417_s3 + $0xf8] sm:$0xff] (!%p1603_p12)  }
 0x122   : > { %2041 = vmatpush1.bf16.msra.mxu0 %v2653_v2  ;;  %2169 = vmatpush1.bf16.msra.mxu1 %v2656_v3 }
 0x123   : > { %2171 = vmatprep.subr.bf16.mxu0 (!%p1603_p12), %v1772_v17  ;;  %2203 = vmatprep.subr.bf16.mxu1 (!%p1603_p12), %v1788_v19  ;;  %v2862_v17 = vmov (!%p1603_p12), 0.0  }
 0x125   : > { %898 = vmatmul.mubr.f32.vlgmr.msra.gmra.mrb[0].mxu0 %v376_v4  ;;  %1040 = vmatmul.mubr.f32.vlgmr.msra.gmra.mrb[0].mxu1 %v376_v4  ;;  %v1771_v4 = vld [vmem:[%s3417_s3 + $0x38] sm:$0xff] (!%p1603_p12)  }
 0x126   : > { %2173 = vmatpush3.bf16.msra.mxu0 (!%p1603_p12), %v1614_v18  ;;  %2205 = vmatpush3.bf16.msra.mxu1 (!%p1603_p12), %v1780_v21 }
 0x127   : > { %2175 = vmatprep.subr.bf16.mxu0 (!%p1603_p12), %v1773_v22  ;;  %2207 = vmatprep.subr.bf16.mxu1 (!%p1603_p12), %v1789_v23 }
 0x12a   : > { %2177 = vmatpush3.bf16.msra.mxu0 (!%p1603_p12), %v1765_v24  ;;  %2209 = vmatpush3.bf16.msra.mxu1 (!%p1603_p12), %v1781_v25 }
 0x12b   : > { %2179 = vmatprep.subr.bf16.mxu0 (!%p1603_p12), %v1774_v26  ;;  %2211 = vmatprep.subr.bf16.mxu1 (!%p1603_p12), %v1790_v27 }
 0x12e   : > { %2181 = vmatpush3.bf16.msra.mxu0 (!%p1603_p12), %v1766_v29  ;;  %2213 = vmatpush3.bf16.msra.mxu1 (!%p1603_p12), %v1782_v30 }
 0x12f   : > { %2183 = vmatprep.subr.bf16.mxu0 (!%p1603_p12), %v1775_v31  ;;  %2215 = vmatprep.subr.bf16.mxu1 (!%p1603_p12), %v1791_v32 }
 0x132   : > { %2185 = vmatpush3.bf16.msra.mxu0 (!%p1603_p12), %v1767_v35  ;;  %2217 = vmatpush3.bf16.msra.mxu1 (!%p1603_p12), %v1783_v36 }
 0x133   : > { %2187 = vmatprep.subr.bf16.mxu0 (!%p1603_p12), %v1776_v40  ;;  %2219 = vmatprep.subr.bf16.mxu1 (!%p1603_p12), %v1792_v41 }
 0x136   : > { %2189 = vmatpush3.bf16.msra.mxu0 (!%p1603_p12), %v1768_v46  ;;  %2221 = vmatpush3.bf16.msra.mxu1 (!%p1603_p12), %v1784_v47 }
 0x137   : > { %2191 = vmatprep.subr.bf16.mxu0 (!%p1603_p12), %v1777_v48  ;;  %2223 = vmatprep.subr.bf16.mxu1 (!%p1603_p12), %v1793_v49 }
 0x13a   : > { %2193 = vmatpush3.bf16.msra.mxu0 (!%p1603_p12), %v1769_v54  ;;  %2225 = vmatpush3.bf16.msra.mxu1 (!%p1603_p12), %v1785_v55 }
 0x13b   : > { %2195 = vmatprep.subr.bf16.mxu0 (!%p1603_p12), %v1778_v56  ;;  %2227 = vmatprep.subr.bf16.mxu1 (!%p1603_p12), %v1794_v57 }
 0x13e   : > { %2197 = vmatpush3.bf16.msra.mxu0 (!%p1603_p12), %v1770_v62  ;;  %2229 = vmatpush3.bf16.msra.mxu1 (!%p1603_p12), %v1786_v63 }
 0x13f   : > { %2199 = vmatprep.subr.bf16.mxu0 (!%p1603_p12), %v1779_v0  ;;  %2231 = vmatprep.subr.bf16.mxu1 (!%p1603_p12), %v1795_v1 }
 0x142   : > { %2201 = vmatpush3.bf16.msra.mxu0 (!%p1603_p12), %v1771_v4 }
 0x1f6   : > { %1057 = sbr.rel (%p1603_p12) target bundleno = 1273 (0x4f9), region = 76 }
 0x1f8   : > { %v899_v9 = vpop.f32.mrb[0].mxu0  ;;  %v1041_v10 = vpop.f32.mrb[0].mxu1 }
 0x1f9   : > { %v1046_v11 = vadd.f32 %v899_v9, %v370_v5  ;;  %v1048_v12 = vadd.f32 %v1041_v10, %v372_v6  ;;  %v901_v13 = vpop.f32.mrb[1].mxu0  ;;  %v1043_v14 = vpop.f32.mrb[1].mxu1  ;;  %v1787_v5 = vld [vmem:[%s3417_s3 + $0xb8] sm:$0xff] (!%p1603_p12)   ;;  %v1742_v9 = vld [vmem:[%s3419_s5] sm:$0xff] (!%p1603_p12)   ;;  %v1796_v10 = vld [vmem:[%s3419_s5 + $0x8] sm:$0xff] (!%p1603_p12)  }
 0x1fa   : > { %v1047_v15 = vadd.f32 %v901_v13, %v371_v7  ;;  %v1049_v16 = vadd.f32 %v1043_v14, %v373_v8  ;;  %2233 = vmatpush3.bf16.msra.mxu1 (!%p1603_p12), %v1787_v5  ;;  %v2861_v8 = vmov (!%p1603_p12), 0.0|0.0   ;;  %v1799_v13 = vld [vmem:[%s3419_s5 + $0x20] sm:$0xff] (!%p1603_p12)   ;;  %v1800_v14 = vld [vmem:[%s3419_s5 + $0x28] sm:$0xff] (!%p1603_p12)  }
 0x1fb   : > { %1050 = vst [vmem:[#allocation2] sm:$0xff] %v1046_v11  ;;  %1052 = vst [vmem:[#allocation2 + $0x10] sm:$0xff] %v1048_v12  ;;  %2234 = vmatprep.subr.bf16.mxu0 (!%p1603_p12), %v2861_v8  ;;  %v1797_v11 = vld [vmem:[%s3419_s5 + $0x10] sm:$0xff] (!%p1603_p12)   ;;  %v1798_v12 = vld [vmem:[%s3419_s5 + $0x18] sm:$0xff] (!%p1603_p12)  }
 0x1fc   : > { %1051 = vst [vmem:[#allocation2 + $0x8] sm:$0xff] %v1047_v15  ;;  %1053 = vst [vmem:[#allocation2 + $0x18] sm:$0xff] %v1049_v16  ;;  %v1380_v15 = vld [vmem:[%s3419_s5 + $0x30] sm:$0x3] (!%p1603_p12) }
 0x1fd   : > { %v1393_v16 = vunpack.c.l.bf16 %v1380_v15 }
 0x202   : > { %v1058_v60 = vld [vmem:[#allocation2] sm:$0xff]  ;;  %v1060_v61 = vld [vmem:[#allocation2 + $0x10] sm:$0xff] }
 0x203   : > { %v1059_v37 = vld [vmem:[#allocation2 + $0x8] sm:$0xff]  ;;  %v1061_v39 = vld [vmem:[#allocation2 + $0x18] sm:$0xff]  ;;  %v1084_v2 = vadd.f32 %v1067_v58, %v1058_v60  ;;  %v1086_v3 = vadd.f32 %v1075_v59, %v1060_v61 }
 0x204   : > { %v1085_v44 = vadd.f32 %v1071_v42, %v1059_v37  ;;  %v1087_v45 = vadd.f32 %v1079_v43, %v1061_v39 }
 0x205   : > { %v1088_v6 = vmax.f32 %v1084_v2, 0.0  ;;  %v1090_v7 = vmax.f32 %v1086_v3, 0.0 }
 0x206   : > { %v1089_v50 = vmax.f32 %v1085_v44, 0.0  ;;  %v1091_v51 = vmax.f32 %v1087_v45, 0.0 }
 0x208   : > { %1291 = vmatprep.mubr.f32.mxu0 %v1089_v50  ;;  %1361 = vmatprep.mubr.f32.mxu1 %v1091_v51 }
 0x209   : > { %1292 = vmatmul.mubr.f32.vlgmr.msra.gmra.mrb[0].mxu0 %v1088_v6  ;;  %1362 = vmatmul.mubr.f32.vlgmr.msra.gmra.mrb[0].mxu1 %v1090_v7 }
 0x20a   : > { %2236 = vmatpush3.bf16.msra.mxu0 %v1742_v9  ;;  %1911 = vmatprep.mubr.msk.f32.mxu0 %vm2863_vm1, %v2862_v17 }
 0x20b   : > { %2237 = vmatprep.subr.bf16.mxu0 %v2861_v8 }
 0x20e   : > { %2239 = vmatpush3.bf16.msra.mxu0 %v1796_v10 }
 0x20f   : > { %2240 = vmatprep.subr.bf16.mxu0 %v2861_v8 }
 0x212   : > { %2242 = vmatpush3.bf16.msra.mxu0 %v1797_v11 }
 0x213   : > { %2243 = vmatprep.subr.bf16.mxu0 %v2861_v8 }
 0x216   : > { %2245 = vmatpush3.bf16.msra.mxu0 %v1798_v12 }
 0x217   : > { %2246 = vmatprep.subr.bf16.mxu0 %v2861_v8 }
 0x21a   : > { %2248 = vmatpush3.bf16.msra.mxu0 %v1799_v13 }
 0x21b   : > { %2249 = vmatprep.subr.bf16.mxu0 %v2861_v8 }
 0x21e   : > { %2251 = vmatpush3.bf16.msra.mxu0 %v1800_v14 }
 0x21f   : > { %1909 = vmatprep.subr.mxu0 %v2862_v17 }
 0x222   : > { %1910 = vmatpush3.msk.msra.mxu0 %vm1405_vm0, %v1393_v16 }
 0x2dc   : > { %v1833_v18 = vpop.f32.mrb[0].mxu0  ;;  %v1868_v19 = vpop.f32.mrb[0].mxu1 }
 0x2dd   : > { %v1834_v21 = vpop.f32.mrb[1].mxu0  ;;  %v1869_v22 = vpop.f32.mrb[1].mxu1 }
 0x2de   : > { %v1835_v23 = vadd.f32 %v1834_v21, %v1833_v18  ;;  %v1870_v24 = vadd.f32 %v1869_v22, %v1868_v19 }
 0x2e0   : > { %v1294_v25 = vadd.f32 %v1835_v23, %v1604_v20 }
 0x2e2   : > { %v1364_v26 = vadd.f32 %v1870_v24, %v1294_v25 }
 0x2e4   : > { %v1367_v27 = vmax.f32 %v1364_v26, 0.0 }
 0x2e6   : > { %1912 = vmatmul.mubr.msk.f32.vlgmr.msra.gmra.mrb[2].mxu0 %vm1401_vm2, %v1367_v27 }
 0x3b9   : > { %v1475_v29 = vpop.f32.mrb[2].mxu0 }
 0x3ba   : > { %v1476_v30 = vadd.f32 %v1605_v28, %v1475_v29  ;;  %v1913_v31 = vpop.f32.mrb[3].mxu0 }
 0x3bc   : > { %v1480_v32 = vsel %vm1479_vm3, %v1476_v30, -inf }
 0x3bd   : > { %1481 = vmax.xlane.f32.xlu0 %v1480_v32 }
 0x44a   : > { %v1482_v33 = vpop.xlane.xlu0 %1481 }
 0x44b   : > { %v1483_v34 = vsub.f32 %v1476_v30, %v1482_v33 }
 0x44d   : > { %v1484_v35 = vmul.f32 1.442695, %v1483_v34 }
 0x44f   : > { %2657 = vpow2.f32 %v1484_v35 }
 0x459   : > { %v2658_v36 = vpop.eup %2657 }
 0x45a   : > { %v1486_v37 = vsel %vm1479_vm3, %v2658_v36, 0.0 }
 0x45b   : > { %1487 = vadd.xlane.f32.xlu0 %v1486_v37 }
 0x4e8   : > { %v1488_v38 = vpop.xlane.xlu0 %1487 }
 0x4e9   : > { %2659 = vlog2.f32 %v1488_v38 }
 0x4f3   : > { %v2660_v39 = vpop.eup %2659 }
 0x4f4   : > { %v1490_v40 = vmul.f32 0.6931472, %v2660_v39 }
 0x4f6   : > { %v1491_v41 = vsub.f32 %v1483_v34, %v1490_v40 }
 0x4f8   : > { %1492 = vst.msk [vmem:[%s3421_s7] sm:$0xff] %vm1479_vm3, %v1491_v41 }
 0x4f9 PF: > { %p21_p0 = scmp.ge.s32.totalorder %s3025_s20, 6   ;;  %s3437_s24 = smov %s2843_s25 }
 0x4fa   : > { %s3438_s25 = smov %s2847_s26  ;;  %s3439_s26 = smov %s3035_s22 }
 0x4fb   : > { %s3440_s27 = smov %s3025_s20  ;;  %23 = sbr.rel (!%p21_p0) target bundleno = 6 (0x6), region = 117 }
 0x502   :  { %1504 = vsyncpa [#allocation4], 1 }
 0x503   :  { %1506 = vsyncpa [#allocation4 + $0x1], 1 }
 0x504   :  { %1507 = vsyncpa [#allocation6], 1 }
 0x505   :  { %1509 = vsyncpa [#allocation6 + $0x1], 1 }
 0x506   :  { %1510 = vsyncpa [#allocation9], 1 }

</bundles_post_ra>
